<compile_context>
chip_gen: v5e
topology: v5e:2x2
jax: 0.10.0
libtpu: 0.0.40
codegen_flags: <defaults>
</compile_context>

<pallas_src>
import jax
import jax.numpy as jnp
import numpy as np
from jax.experimental import pallas as pl
from jax.experimental.pallas import tpu as pltpu


def _round_up(x, m):
    return ((x + m - 1) // m) * m


# ---------------------------------------------------------------------------
# Kernels
# ---------------------------------------------------------------------------
def _resident_kernel(x_ref, w1_ref, t1_ref, w2_ref, t2_ref, o_ref):
    """Whole (Dp, Dp) weights resident in VMEM; 1-D grid over batch tiles."""
    # Linear1 (+ folded BN1) -> ReLU.  Cast the x tile to bf16 inline: do NOT keep a
    # f32 copy of the tile live across both matmuls (avoids a VMEM spill copy).
    h = jnp.dot(x_ref[...].astype(jnp.bfloat16), w1_ref[...],
                preferred_element_type=jnp.float32) + t1_ref[...]
    h = jnp.maximum(h, 0.0)
    # Dropout(0.2): identity in eval mode.

    # Linear2 (+ folded BN2)
    z = jnp.dot(h.astype(jnp.bfloat16), w2_ref[...],
                preferred_element_type=jnp.float32) + t2_ref[...]

    # Residual add + final ReLU; re-read x_ref (already in VMEM) for the residual.
    o_ref[...] = jnp.maximum(z + x_ref[...], 0.0).astype(o_ref.dtype)


def _streamed_kernel(x_ref, w1_ref, t1_ref, w2_ref, t2_ref, o_ref, acc_ref):
    """Hidden dim chunked over grid axis 1; weight chunks streamed through the pipeline
    (weight DMA overlaps the MXU), second matmul accumulated in f32 scratch."""
    k = pl.program_id(1)

    @pl.when(k == 0)
    def _():
        acc_ref[...] = jnp.zeros_like(acc_ref)

    # h chunk = relu(x @ w1[:, k*TK:(k+1)*TK] + t1_chunk).  ReLU / Dropout are elementwise
    # per hidden feature, so chunking the hidden dimension is exact.
    h = jnp.dot(x_ref[...].astype(jnp.bfloat16), w1_ref[...],
                preferred_element_type=jnp.float32) + t1_ref[...]
    h = jnp.maximum(h, 0.0)
    # Dropout(0.2): identity in eval mode.
    acc_ref[...] += jnp.dot(h.astype(jnp.bfloat16), w2_ref[...],
                            preferred_element_type=jnp.float32)

    @pl.when(k == pl.num_programs(1) - 1)
    def _():
        o_ref[...] = jnp.maximum(acc_ref[...] + t2_ref[...] + x_ref[...],
                                 0.0).astype(o_ref.dtype)


# ---------------------------------------------------------------------------
# VMEM budgeting
# ---------------------------------------------------------------------------
def _vmem_ceiling():
    try:
        cap = int(pltpu.get_tpu_info().vmem_capacity_bytes)
    except Exception:
        cap = 64 << 20                     # conservative fallback: v7x per-TensorCore VMEM
    return int(cap * 0.85)                 # leave headroom for Mosaic internal scratch


def _resident_vmem_bytes(Dp, TB):
    return (2 * Dp * Dp * 2                # two bf16 weights, single-buffered
            + 2 * 2 * TB * Dp * 4          # x / out f32 tiles, double-buffered
            + 2 * Dp * 4)                  # shift rows, single-buffered


def _streamed_vmem_bytes(Dp, TB, TK):
    return (2 * 2 * Dp * TK * 2            # w1 / w2 chunks, double-buffered
            + 2 * 2 * TB * Dp * 4          # x / out f32 tiles, double-buffered
            + TB * Dp * 4                  # f32 accumulator scratch
            + 2 * 2 * TK * 4 + Dp * 4)     # shift rows


# ---------------------------------------------------------------------------
# Wrapper
# ---------------------------------------------------------------------------
def residual_block(x, fp, *, block_b=512, block_k=None, mode="auto"):
    """x: (B, D) float32.  fp: folded+padded params from fold_and_pad_params().

    mode: "auto" | "resident" | "streamed".
    """
    B, D = x.shape
    Dp = fp["w1"].shape[0]                 # lane-padded feature dim (multiple of 128)

    # Feature padding only if D is not lane-aligned.  No batch padding: the ragged last
    # batch tile is handled by the cdiv grid (Pallas masks the partial block).
    xp = x
    if Dp != D:
        xp = jnp.zeros((B, Dp), x.dtype).at[:, :D].set(x)

    TB = min(block_b, _round_up(B, 8))     # batch tile, multiple of 8, no rounding waste
    ceiling = _vmem_ceiling()

    if mode == "auto":
        if _resident_vmem_bytes(Dp, TB) > 0.9 * ceiling:
            mode = "streamed"              # e.g. large D on v7x (64 MiB / TensorCore)
        elif pl.cdiv(B, TB) == 1 and 2 * Dp * Dp * 2 > (8 << 20):
            mode = "streamed"              # single batch tile: overlap the weight DMA with MXU
        else:
            mode = "resident"

    flops = 4 * B * Dp * Dp
    bytes_accessed = 2 * B * Dp * 4 + 2 * Dp * Dp * 2
    cost = pl.CostEstimate(flops=flops, transcendentals=0, bytes_accessed=bytes_accessed)

    if mode == "resident":
        while TB > 8 and _resident_vmem_bytes(Dp, TB) > ceiling:
            TB = max(8, _round_up(TB // 2, 8))
        nb = pl.cdiv(B, TB)
        vmem_limit = int(min(max(_resident_vmem_bytes(Dp, TB) + (4 << 20), 32 << 20), ceiling))

        tile_spec = pl.BlockSpec((TB, Dp), lambda i: (i, 0))          # streamed activations
        w_spec = pl.BlockSpec((Dp, Dp), lambda i: (0, 0),
                              pipeline_mode=pl.Buffered(1))           # resident, single-buffered
        v_spec = pl.BlockSpec((1, Dp), lambda i: (0, 0),
                              pipeline_mode=pl.Buffered(1))

        out = pl.pallas_call(
            _resident_kernel,
            out_shape=jax.ShapeDtypeStruct((B, Dp), x.dtype),
            grid=(nb,),
            in_specs=[tile_spec, w_spec, v_spec, w_spec, v_spec],
            out_specs=tile_spec,
            compiler_params=pltpu.CompilerParams(
                dimension_semantics=("parallel",),
                vmem_limit_bytes=vmem_limit),
            cost_estimate=cost,
        )(xp, fp["w1"], fp["t1"], fp["w2"], fp["t2"])

    else:  # streamed hidden-dim chunks
        if block_k is None:
            TK = next(c for c in (512, 384, 256, 128) if Dp % c == 0)
        else:
            TK = block_k
        assert Dp % TK == 0 and TK % 128 == 0, "block_k must be a 128-multiple dividing Dp"
        while TB > 8 and _streamed_vmem_bytes(Dp, TB, TK) > ceiling:
            TB = max(8, _round_up(TB // 2, 8))
        nb, kt = pl.cdiv(B, TB), Dp // TK
        vmem_limit = int(min(max(_streamed_vmem_bytes(Dp, TB, TK) + (4 << 20), 32 << 20),
                             ceiling))

        out = pl.pallas_call(
            _streamed_kernel,
            out_shape=jax.ShapeDtypeStruct((B, Dp), x.dtype),
            grid=(nb, kt),
            in_specs=[pl.BlockSpec((TB, Dp), lambda i, k: (i, 0)),    # x (constant across k)
                      pl.BlockSpec((Dp, TK), lambda i, k: (0, k)),    # w1 column chunk
                      pl.BlockSpec((1, TK), lambda i, k: (0, k)),     # t1 chunk
                      pl.BlockSpec((TK, Dp), lambda i, k: (k, 0)),    # w2 row chunk
                      pl.BlockSpec((1, Dp), lambda i, k: (0, 0),
                                   pipeline_mode=pl.Buffered(1))],    # t2 (resident)
            out_specs=pl.BlockSpec((TB, Dp), lambda i, k: (i, 0)),
            scratch_shapes=[pltpu.VMEM((TB, Dp), jnp.float32)],
            compiler_params=pltpu.CompilerParams(
                dimension_semantics=("parallel", "arbitrary"),
                vmem_limit_bytes=vmem_limit),
            cost_estimate=cost,
        )(xp, fp["w1"], fp["t1"], fp["w2"], fp["t2"])

    return out if Dp == D else out[:, :D]


# ---------------------------------------------------------------------------
# Parameter construction / folding
# ---------------------------------------------------------------------------
def make_params(key, dim):
    """Raw PyTorch-style parameters (deterministic)."""
    ks = jax.random.split(key, 12)
    bound = 1.0 / np.sqrt(dim)
    u = lambda k, s: jax.random.uniform(k, s, jnp.float32, -bound, bound)
    n = lambda k, s, sc: sc * jax.random.normal(k, s, jnp.float32)
    return {
        # nn.Linear(dim, dim): weight (out, in), bias (out,)
        "w1": u(ks[0], (dim, dim)), "b1": u(ks[1], (dim,)),
        "w2": u(ks[2], (dim, dim)), "b2": u(ks[3], (dim,)),
        # nn.BatchNorm1d(dim): gamma, beta, running_mean, running_var
        "g1": 1.0 + n(ks[4], (dim,), 0.1), "beta1": n(ks[5], (dim,), 0.1),
        "m1": n(ks[6], (dim,), 0.1),
        "v1": 1.0 + jax.random.uniform(ks[7], (dim,), jnp.float32, 0.0, 0.1),
        "g2": 1.0 + n(ks[8], (dim,), 0.1), "beta2": n(ks[9], (dim,), 0.1),
        "m2": n(ks[10], (dim,), 0.1),
        "v2": 1.0 + jax.random.uniform(ks[11], (dim,), jnp.float32, 0.0, 0.1),
    }


def fold_and_pad_params(raw, eps=1e-5, lane=128):
    """Fold BN(eval) + Linear bias into (bf16 weight, f32 shift); pad features to mult of `lane`.

    bn(z) = z*s + (beta - m*s),   s = gamma / sqrt(var + eps)
    bn(x@W^T + b) = x @ (W^T * s) + (b*s + beta - m*s)

    On v6e/v7x (256-wide MXU) passing lane=256 can improve MXU utilization for odd-128 dims.
    """
    D = raw["w1"].shape[0]
    Dp = _round_up(D, lane)

    def fold(w, b, g, beta, m, v):
        s = g / jnp.sqrt(v + eps)                         # (D,)
        w_f = w.T * s[None, :]                            # (D_in, D_out), BN scale in columns
        t = b * s + (beta - m * s)                        # (D,)
        if Dp == D:
            return w_f.astype(jnp.bfloat16), t.reshape(1, D)
        w_p = jnp.zeros((Dp, Dp), jnp.float32).at[:D, :D].set(w_f).astype(jnp.bfloat16)
        t_p = jnp.zeros((1, Dp), jnp.float32).at[0, :D].set(t)
        return w_p, t_p

    w1, t1 = fold(raw["w1"], raw["b1"], raw["g1"], raw["beta1"], raw["m1"], raw["v1"])
    w2, t2 = fold(raw["w2"], raw["b2"], raw["g2"], raw["beta2"], raw["m2"], raw["v2"])
    return {"w1": w1, "t1": t1, "w2": w2, "t2": t2}


# ---------------------------------------------------------------------------
# References
# ---------------------------------------------------------------------------
def residual_block_ref_f32(x, raw, eps=1e-5):
    """Pure-JAX f32 reference with PyTorch eval semantics."""
    h = x @ raw["w1"].T + raw["b1"]
    h = (h - raw["m1"]) / jnp.sqrt(raw["v1"] + eps) * raw["g1"] + raw["beta1"]
    h = jnp.maximum(h, 0.0)
    # Dropout(0.2) identity in eval
    z = h @ raw["w2"].T + raw["b2"]
    z = (z - raw["m2"]) / jnp.sqrt(raw["v2"] + eps) * raw["g2"] + raw["beta2"]
    return jnp.maximum(z + x, 0.0)


def residual_block_ref_matched(x, fp, D):
    """Reference mirroring the kernel's bf16-weight / bf16-activation / f32-accumulate math."""
    Dp = fp["w1"].shape[0]
    xp = x if Dp == D else jnp.zeros((x.shape[0], Dp), x.dtype).at[:, :D].set(x)
    h = jnp.dot(xp.astype(jnp.bfloat16), fp["w1"],
                preferred_element_type=jnp.float32) + fp["t1"]
    h = jnp.maximum(h, 0.0)
    z = jnp.dot(h.astype(jnp.bfloat16), fp["w2"],
                preferred_element_type=jnp.float32) + fp["t2"]
    return jnp.maximum(z + xp, 0.0)[:, :D]


# ---------------------------------------------------------------------------
if __name__ == "__main__":
    key = jax.random.PRNGKey(0)
    kx, kp, kx2, kp2 = jax.random.split(key, 4)

    # --- resident-weight path: dim=32 (lane-padded to 128), batch=8 ---
    B, DIM = 8, 32
    x = jax.random.normal(kx, (B, DIM), jnp.float32)
    raw = make_params(kp, DIM)
    fp = fold_and_pad_params(raw)

    out = jax.block_until_ready(residual_block(x, fp, mode="resident"))
    np.testing.assert_allclose(np.asarray(out),
                               np.asarray(residual_block_ref_matched(x, fp, DIM)),
                               rtol=5e-3, atol=5e-3)
    np.testing.assert_allclose(np.asarray(out),
                               np.asarray(residual_block_ref_f32(x, raw)),
                               rtol=3e-2, atol=3e-2)

    # --- streamed-weight path (hidden dim chunked, 2 chunks): dim=256, batch=8 ---
    B2, DIM2 = 8, 256
    x2 = jax.random.normal(kx2, (B2, DIM2), jnp.float32)
    raw2 = make_params(kp2, DIM2)
    fp2 = fold_and_pad_params(raw2)

    out2 = jax.block_until_ready(residual_block(x2, fp2, mode="streamed", block_k=128))
    np.testing.assert_allclose(np.asarray(out2),
                               np.asarray(residual_block_ref_matched(x2, fp2, DIM2)),
                               rtol=5e-3, atol=5e-3)
    np.testing.assert_allclose(np.asarray(out2),
                               np.asarray(residual_block_ref_f32(x2, raw2)),
                               rtol=3e-2, atol=3e-2)

    print("KERNEL_OK")
</pallas_src>

<mosaic_0001>
module attributes {stable_mosaic.version = 11 : i64} {
  func.func @_resident_kernel(%arg0: i32, %arg1: memref<8x128xf32, #tpu.memory_space<vmem>>, %arg2: memref<128x128xbf16, #tpu.memory_space<vmem>>, %arg3: memref<1x128xf32, #tpu.memory_space<vmem>>, %arg4: memref<128x128xbf16, #tpu.memory_space<vmem>>, %arg5: memref<1x128xf32, #tpu.memory_space<vmem>>, %arg6: memref<8x128xf32, #tpu.memory_space<vmem>>) attributes {dimension_semantics = [#tpu.dimension_semantics<parallel>], iteration_bounds = array<i64: 1>, scalar_prefetch = 0 : i64, scratch_operands = 0 : i64, tpu.core_type = #tpu.core_type<tc>, window_params = [{transform_indices = @transform_0, window_bounds = array<i64: 8, 128>}, {pipeline_mode = #tpu.pipeline_mode<synchronous>, transform_indices = @transform_1, window_bounds = array<i64: 128, 128>}, {pipeline_mode = #tpu.pipeline_mode<synchronous>, transform_indices = @transform_2, window_bounds = array<i64: 1, 128>}, {pipeline_mode = #tpu.pipeline_mode<synchronous>, transform_indices = @transform_3, window_bounds = array<i64: 128, 128>}, {pipeline_mode = #tpu.pipeline_mode<synchronous>, transform_indices = @transform_4, window_bounds = array<i64: 1, 128>}, {transform_indices = @transform_5, window_bounds = array<i64: 8, 128>}]} {
    %c0 = arith.constant 0 : index
    %c0_0 = arith.constant 0 : index
    %0 = vector.load %arg1[%c0, %c0_0] : memref<8x128xf32, #tpu.memory_space<vmem>>, vector<8x128xf32>
    %1 = arith.truncf %0 : vector<8x128xf32> to vector<8x128xbf16>
    %c0_1 = arith.constant 0 : index
    %c0_2 = arith.constant 0 : index
    %2 = vector.load %arg2[%c0_1, %c0_2] : memref<128x128xbf16, #tpu.memory_space<vmem>>, vector<128x128xbf16>
    %cst = arith.constant dense<0.000000e+00> : vector<8x128xf32>
    %3 = tpu.matmul %1, %2, %cst {dimension_numbers = #tpu.dot_dimension_numbers<[1], [0], [0], [1], [0, 0, 1, 1], [], []>} : vector<8x128xbf16>, vector<128x128xbf16>, vector<8x128xf32> -> vector<8x128xf32>
    %c0_3 = arith.constant 0 : index
    %c0_4 = arith.constant 0 : index
    %4 = vector.load %arg3[%c0_3, %c0_4] : memref<1x128xf32, #tpu.memory_space<vmem>>, vector<1x128xf32>
    %5 = vector.broadcast %4 : vector<1x128xf32> to vector<8x128xf32>
    %6 = arith.addf %3, %5 : vector<8x128xf32>
    %cst_5 = arith.constant 0.000000e+00 : f32
    %7 = vector.broadcast %cst_5 : f32 to vector<8x128xf32>
    %8 = arith.maximumf %6, %7 : vector<8x128xf32>
    %9 = arith.truncf %8 : vector<8x128xf32> to vector<8x128xbf16>
    %c0_6 = arith.constant 0 : index
    %c0_7 = arith.constant 0 : index
    %10 = vector.load %arg4[%c0_6, %c0_7] : memref<128x128xbf16, #tpu.memory_space<vmem>>, vector<128x128xbf16>
    %cst_8 = arith.constant dense<0.000000e+00> : vector<8x128xf32>
    %11 = tpu.matmul %9, %10, %cst_8 {dimension_numbers = #tpu.dot_dimension_numbers<[1], [0], [0], [1], [0, 0, 1, 1], [], []>} : vector<8x128xbf16>, vector<128x128xbf16>, vector<8x128xf32> -> vector<8x128xf32>
    %c0_9 = arith.constant 0 : index
    %c0_10 = arith.constant 0 : index
    %12 = vector.load %arg5[%c0_9, %c0_10] : memref<1x128xf32, #tpu.memory_space<vmem>>, vector<1x128xf32>
    %13 = vector.broadcast %12 : vector<1x128xf32> to vector<8x128xf32>
    %14 = arith.addf %11, %13 : vector<8x128xf32>
    %c0_11 = arith.constant 0 : index
    %c0_12 = arith.constant 0 : index
    %15 = vector.load %arg1[%c0_11, %c0_12] : memref<8x128xf32, #tpu.memory_space<vmem>>, vector<8x128xf32>
    %16 = arith.addf %14, %15 : vector<8x128xf32>
    %cst_13 = arith.constant 0.000000e+00 : f32
    %17 = vector.broadcast %cst_13 : f32 to vector<8x128xf32>
    %18 = arith.maximumf %16, %17 : vector<8x128xf32>
    %c0_14 = arith.constant 0 : index
    %c0_15 = arith.constant 0 : index
    %19 = vector.load %arg6[%c0_14, %c0_15] : memref<8x128xf32, #tpu.memory_space<vmem>>, vector<8x128xf32>
    tpu.vector_store %arg6[%c0_14, %c0_15], %18 {strides = array<i32>} : memref<8x128xf32, #tpu.memory_space<vmem>>, vector<8x128xf32>,
    return
  }
  func.func @transform_0(%arg0: i32) -> (i32, i32) {
    %c0_i32 = arith.constant 0 : i32
    %c0_i32_0 = arith.constant 0 : i32
    return %arg0, %c0_i32 : i32, i32
  }
  func.func @transform_1(%arg0: i32) -> (i32, i32) {
    %c0_i32 = arith.constant 0 : i32
    %c0_i32_0 = arith.constant 0 : i32
    %c0_i32_1 = arith.constant 0 : i32
    return %c0_i32, %c0_i32_0 : i32, i32
  }
  func.func @transform_2(%arg0: i32) -> (i32, i32) {
    %c0_i32 = arith.constant 0 : i32
    %c0_i32_0 = arith.constant 0 : i32
    %c0_i32_1 = arith.constant 0 : i32
    return %c0_i32, %c0_i32_0 : i32, i32
  }
  func.func @transform_3(%arg0: i32) -> (i32, i32) {
    %c0_i32 = arith.constant 0 : i32
    %c0_i32_0 = arith.constant 0 : i32
    %c0_i32_1 = arith.constant 0 : i32
    return %c0_i32, %c0_i32_0 : i32, i32
  }
  func.func @transform_4(%arg0: i32) -> (i32, i32) {
    %c0_i32 = arith.constant 0 : i32
    %c0_i32_0 = arith.constant 0 : i32
    %c0_i32_1 = arith.constant 0 : i32
    return %c0_i32, %c0_i32_0 : i32, i32
  }
  func.func @transform_5(%arg0: i32) -> (i32, i32) {
    %c0_i32 = arith.constant 0 : i32
    %c0_i32_0 = arith.constant 0 : i32
    return %arg0, %c0_i32 : i32, i32
  }
}

</mosaic_0001>

<bundles_post_ra>
// kernel: tpu_custom_call.1
= control target key start
LH: loop header
LB: loop body
LE: loop exit
PB: predicated region body
PF: predicated region fallthrough
CT: control target
= control target key end

     0   :  { %10 = vsyncpa [#allocation3], 0  ;;  %s497_s0 = inlined_call_operand.hbm [shape: f32[8,128], index: 0, kind: input, shape index: {}]   ;;  %s498_s1 = inlined_call_operand.hbm [shape: bf16[128,128], index: 1, kind: input, shape index: {}]   ;;  %s499_s2 = inlined_call_operand.vmem [shape: f32[1,128], index: 2, kind: input, shape index: {}]   ;;  %s500_s3 = inlined_call_operand.hbm [shape: bf16[128,128], index: 3, kind: input, shape index: {}]   ;;  %s501_s4 = inlined_call_operand.vmem [shape: f32[1,128], index: 4, kind: input, shape index: {}]   ;;  %s502_s5 = inlined_call_operand.hbm [shape: f32[8,128], index: 5, kind: output, shape index: {}]  }
   0x1   :  { %11 = vsyncpa [#allocation6], 0  ;;  %s28_s20 = sshll.u32 %s498_s1, 4  ;;  %s29_s20 = int_to_ptr.hbm [resolvable:$true] %s28_s20 }
   0x2   :  { %12 = vsyncpa [#allocation4], 0  ;;  %s443_s21 = smov [#allocation5]   ;;  %s18_s25 = sshll.u32 %s497_s0, 4  ;;  %s19_s25 = int_to_ptr.hbm [resolvable:$true] %s18_s25 }
   0x3   :  { %s30_s22 = sshll.u32 %s443_s21, 4  ;;  %s444_s26 = smov 64   ;;  %s31_s22 = int_to_ptr.vmem [resolvable:$true] %s30_s22 }
   0x4   :  { %s445_s27 = smov 4   ;;  %s446_s28 = smov [#allocation2]  }
   0x5   :  { %36 = dma.hbm_to_vmem [thread:$0]  %s29_s20, 1024, %s31_s22, [#allocation6], %s444_s26, %s444_s26, %s445_s27  }
   0x6   :  { %s20_s29 = sshll.u32 %s446_s28, 4  ;;  %s43_s7 = sshll.u32 %s500_s3, 4  ;;  %s21_s29 = int_to_ptr.vmem [resolvable:$true] %s20_s29  ;;  %s44_s7 = int_to_ptr.hbm [resolvable:$true] %s43_s7 }
   0x7   :  { %23 = dma.hbm_to_vmem [thread:$0]  %s19_s25, 128, %s21_s29, [#allocation3]  }
   0x8   :  { %s447_s1 = smov [#allocation7]  }
   0x9   :  { %s45_s8 = sshll.u32 %s447_s1, 4  ;;  %s46_s8 = int_to_ptr.vmem [resolvable:$true] %s45_s8 }
   0xa   :  { %51 = dma.hbm_to_vmem [thread:$0]  %s44_s7, 1024, %s46_s8, [#allocation6], %s444_s26, %s444_s26, %s445_s27  }
   0xb   :  { %437 = dma.done.wait [#allocation3], 128  }
   0xc   :  { %438 = vsyncadd [#allocation3], 4294967168 }
   0xd   :  { %439 = dma.done.wait [#allocation6], 2048  }
   0xe   :  { %440 = vsyncadd [#allocation6], 4294965248  ;;  %v324_v0 = vld [vmem:[#allocation5 + $0x38] sm:$0xff]  ;;  %v323_v1 = vld [vmem:[#allocation5 + $0x30] sm:$0xff]  ;;  %s448_s11 = smov [#allocation8]   ;;  %s242_s15 = sshll.u32 %s502_s5, 4  ;;  %s243_s15 = int_to_ptr.hbm [resolvable:$true] %s242_s15 }
   0xf   :  { %136 = vmatpush.bf16.msra.mxu0 %v324_v0  ;;  %v332_v2 = vld [vmem:[#allocation7 + $0x38] sm:$0xff]  ;;  %v331_v3 = vld [vmem:[#allocation7 + $0x30] sm:$0xff]  ;;  %v322_v4 = vld [vmem:[#allocation5 + $0x28] sm:$0xff]  ;;  %s240_s12 = sshll.u32 %s448_s11, 4  ;;  %s241_s12 = int_to_ptr.vmem [resolvable:$true] %s240_s12 }
  0x10   :  { %219 = vmatpush.bf16.msra.mxu1 %v332_v2  ;;  %v330_v5 = vld [vmem:[#allocation7 + $0x28] sm:$0xff]  ;;  %v321_v6 = vld [vmem:[#allocation5 + $0x20] sm:$0xff]  ;;  %v320_v8 = vld [vmem:[#allocation5 + $0x18] sm:$0xff] }
  0x11   :  { %v329_v7 = vld [vmem:[#allocation7 + $0x20] sm:$0xff]  ;;  %v328_v9 = vld [vmem:[#allocation7 + $0x18] sm:$0xff]  ;;  %v319_v10 = vld [vmem:[#allocation5 + $0x10] sm:$0xff] }
  0x12   :  { %v327_v11 = vld [vmem:[#allocation7 + $0x10] sm:$0xff]  ;;  %v318_v12 = vld [vmem:[#allocation5 + $0x8] sm:$0xff]  ;;  %v317_v13 = vld [vmem:[#allocation5] sm:$0xff] }
  0x13   :  { %137 = vmatpush.bf16.msra.mxu0 %v323_v1  ;;  %v66_v14 = vld [vmem:[#allocation2] sm:$0xff]  ;;  %v326_v16 = vld [vmem:[#allocation7 + $0x8] sm:$0xff]  ;;  %v325_v17 = vld [vmem:[#allocation7] sm:$0xff] }
  0x14   :  { %220 = vmatpush.bf16.msra.mxu1 %v331_v3  ;;  %v67_v15 = vpack.c.bf16 %v66_v14, %v66_v14  ;;  %v339_v18 = vld [vmem:[%s499_s2] ss:$0 sm:$0xff] }
  0x15   :  { %v340_v24 = vld [vmem:[%s501_s4] ss:$0 sm:$0xff] }
  0x17   :  { %138 = vmatpush.bf16.msra.mxu0 %v322_v4 }
  0x18   :  { %221 = vmatpush.bf16.msra.mxu1 %v330_v5 }
  0x1b   :  { %139 = vmatpush.bf16.msra.mxu0 %v321_v6 }
  0x1c   :  { %222 = vmatpush.bf16.msra.mxu1 %v329_v7 }
  0x1f   :  { %140 = vmatpush.bf16.msra.mxu0 %v320_v8 }
  0x20   :  { %223 = vmatpush.bf16.msra.mxu1 %v328_v9 }
  0x23   :  { %141 = vmatpush.bf16.msra.mxu0 %v319_v10 }
  0x24   :  { %224 = vmatpush.bf16.msra.mxu1 %v327_v11 }
  0x27   :  { %142 = vmatpush.bf16.msra.mxu0 %v318_v12 }
  0x28   :  { %225 = vmatpush.bf16.msra.mxu1 %v326_v16 }
  0x2b   :  { %143 = vmatpush.bf16.msra.mxu0 %v317_v13 }
  0x2c   :  { %226 = vmatpush.bf16.msra.mxu1 %v325_v17 }
  0x2e   :  { %144 = vmatmul.bf16.vlgmr.msra.gmra.mxu0 %v67_v15 }
  0xab   :  { %v145_v19 = vpop.f32.mrf.mxu0 }
  0xac   :  { %v146_v20 = vadd.f32 %v339_v18, %v145_v19 }
  0xae   :  { %v149_v21 = vmax.f32 %v146_v20, 0.0 }
  0xb0   :  { %v150_v22 = vpack.c.bf16 %v149_v21, %v149_v21 }
  0xb2   :  { %227 = vmatmul.bf16.vlgmr.msra.gmra.mxu1 %v150_v22 }
  0xb3   :  { %v147_v23 = vpop.f32.mrf.mxu0 }
 0x12f   :  { %v228_v25 = vpop.f32.mrf.mxu1 }
 0x130   :  { %v229_v26 = vadd.f32 %v340_v24, %v228_v25 }
 0x132   :  { %v232_v27 = vadd.f32 %v229_v26, %v66_v14 }
 0x134   :  { %v233_v28 = vmax.f32 %v232_v27, 0.0 }
 0x136   :  { %234 = vst [vmem:[#allocation8] sm:$0xff] %v233_v28 }
 0x137   :  { %v230_v29 = vpop.f32.mrf.mxu1  ;;  %245 = dma.vmem_to_hbm [thread:$0]  %s241_s12, 128, %s243_s15, [#allocation4]  }
 0x138   :  { %441 = dma.done.wait [#allocation4], 128  }
 0x139   :  { %442 = vsyncadd [#allocation4], 4294967168 }
 0x13a   :  { %250 = vsyncpa [#allocation3], 1 }
 0x13b   :  { %251 = vsyncpa [#allocation6], 1 }
 0x13c   :  { %252 = vsyncpa [#allocation4], 1 }

</bundles_post_ra>
